<compile_context>
chip_gen: v7x
topology: tpu7x:2x2x1
jax: 0.10.0
libtpu: 0.0.40
codegen_flags: <defaults>
</compile_context>

<pallas_src>
import jax
import jax.numpy as jnp
from jax.experimental import pallas as pl
from jax.experimental.pallas import tpu as pltpu

VOCAB_SIZE = 10
EMBEDDING_DIM = 100
OUTPUT_DIM = 1


def _model_kernel(x_ref, emb_ref, w_ref, b_ref, out_ref):
    """Fused embedding-lookup + mean-over-seq + linear head (one batch block).

    x_ref:   (tb, seq, 1)   int32   token indices
    emb_ref: (vocab, D)     f32     embedding table (resident across blocks)
    w_ref:   (D, out)       f32     linear weight (transposed vs torch)
    b_ref:   (1, out)       f32     linear bias
    out_ref: (tb, out)      f32
    """
    tb, seq, _ = x_ref.shape
    vocab, _ = emb_ref.shape

    idx = x_ref[...]  # (tb, seq, 1) int32

    # One-hot over vocab along the lane dim (single-slot VALU compare, no div),
    # then fold the mean over seq into the gather matrix with a sublane sum.
    tok = jax.lax.broadcasted_iota(jnp.int32, (tb, seq, vocab), 2)
    onehot = (idx == tok).astype(jnp.float32)               # (tb, seq, vocab)
    counts = jnp.sum(onehot, axis=1) * jnp.float32(1.0 / seq)  # (tb, vocab)

    # Fuse the linear head into the gather: head = emb @ w is (vocab, out),
    # so the gather matmul operand shrinks to a single padded tile.
    head = jnp.dot(emb_ref[...], w_ref[...], preferred_element_type=jnp.float32)  # (vocab, out)
    out = jnp.dot(counts, head, preferred_element_type=jnp.float32) + b_ref[...]  # (tb, out)

    # out_dim == 1 forces a masked narrow store; inherent to the module spec.
    out_ref[...] = out.astype(out_ref.dtype)


def simple_model_forward(x, emb_table, w, b):
    """x: (batch, seq) int32 token ids -> (batch, OUTPUT_DIM) f32."""
    batch, seq = x.shape
    vocab, emb_dim = emb_table.shape
    out_dim = w.shape[1]

    x3 = x.reshape(batch, seq, 1).astype(jnp.int32)
    b2d = b.reshape(1, out_dim).astype(jnp.float32)

    # Batch-blocked grid; tb sized so double-buffered blocks stay far under the
    # 64 MiB v7x VMEM budget even at large batch.
    tb = batch if batch <= 128 else 128
    grid = (pl.cdiv(batch, tb),)

    return pl.pallas_call(
        _model_kernel,
        out_shape=jax.ShapeDtypeStruct((batch, out_dim), jnp.float32),
        grid=grid,
        in_specs=[
            pl.BlockSpec((tb, seq, 1), lambda i: (i, 0, 0)),        # token ids
            pl.BlockSpec((vocab, emb_dim), lambda i: (0, 0)),       # embedding table
            pl.BlockSpec((emb_dim, out_dim), lambda i: (0, 0)),     # linear weight
            pl.BlockSpec((1, out_dim), lambda i: (0, 0)),           # linear bias
        ],
        out_specs=pl.BlockSpec((tb, out_dim), lambda i: (i, 0)),
        compiler_params=pltpu.CompilerParams(
            dimension_semantics=("parallel",)),
    )(x3, emb_table.astype(jnp.float32), w.astype(jnp.float32), b2d)


def init_params(key, vocab_size, embedding_dim, output_dim, pnorm=None):
    k_emb, k_w, k_b = jax.random.split(key, 3)
    # nn.Embedding default init: N(0, 1)
    emb = jax.random.normal(k_emb, (vocab_size, embedding_dim), dtype=jnp.float32)
    if pnorm is not None:
        norm = jnp.linalg.norm(emb, axis=1, keepdims=True)
        emb = emb * (pnorm / norm)
    # nn.Linear default init: U(-1/sqrt(fan_in), 1/sqrt(fan_in))
    bound = 1.0 / jnp.sqrt(embedding_dim)
    w = jax.random.uniform(k_w, (embedding_dim, output_dim), jnp.float32, -bound, bound)
    b = jax.random.uniform(k_b, (output_dim,), jnp.float32, -bound, bound)
    return emb, w, b


if __name__ == "__main__":
    key = jax.random.PRNGKey(0)
    k_params, k_x = jax.random.split(key)

    emb, w, b = init_params(k_params, VOCAB_SIZE, EMBEDDING_DIM, OUTPUT_DIM, pnorm=None)

    batch, seq = 2, 8
    x = jax.random.randint(k_x, (batch, seq), 0, VOCAB_SIZE, dtype=jnp.int32)

    out = simple_model_forward(x, emb, w, b)
    jax.block_until_ready(out)

    # Pure-JAX reference of the same forward semantics.
    ref = jnp.take(emb, x, axis=0).mean(axis=1) @ w + b
    assert out.shape == (batch, OUTPUT_DIM)
    assert jnp.allclose(out, ref, atol=1e-5, rtol=1e-5)

    print("KERNEL_OK")
</pallas_src>

<mosaic_0001>
module attributes {stable_mosaic.version = 11 : i64} {
  func.func @_model_kernel(%arg0: i32, %arg1: memref<2x8x1xi32, #tpu.memory_space<vmem>>, %arg2: memref<10x100xf32, #tpu.memory_space<vmem>>, %arg3: memref<100x1xf32, #tpu.memory_space<vmem>>, %arg4: memref<1x1xf32, #tpu.memory_space<vmem>>, %arg5: memref<2x1xf32, #tpu.memory_space<vmem>>) attributes {dimension_semantics = [#tpu.dimension_semantics<parallel>], iteration_bounds = array<i64: 1>, scalar_prefetch = 0 : i64, scratch_operands = 0 : i64, tpu.core_type = #tpu.core_type<tc>, window_params = [{transform_indices = @transform_0, window_bounds = array<i64: 2, 8, 1>}, {pipeline_mode = #tpu.pipeline_mode<synchronous>, transform_indices = @transform_1, window_bounds = array<i64: 10, 100>}, {pipeline_mode = #tpu.pipeline_mode<synchronous>, transform_indices = @transform_2, window_bounds = array<i64: 100, 1>}, {pipeline_mode = #tpu.pipeline_mode<synchronous>, transform_indices = @transform_3, window_bounds = array<i64: 1, 1>}, {transform_indices = @transform_4, window_bounds = array<i64: 2, 1>}]} {
    %c0 = arith.constant 0 : index
    %c0_0 = arith.constant 0 : index
    %c0_1 = arith.constant 0 : index
    %0 = vector.load %arg1[%c0, %c0_0, %c0_1] : memref<2x8x1xi32, #tpu.memory_space<vmem>>, vector<2x8x1xi32>
    %1 = tpu.iota {dimensions = array<i32: 2>} : vector<2x8x10xi32>
    %2 = vector.broadcast %0 : vector<2x8x1xi32> to vector<2x8x10xi32>
    %3 = arith.cmpi eq, %2, %1 : vector<2x8x10xi32>
    %4 = arith.extui %3 : vector<2x8x10xi1> to vector<2x8x10xi32>
    %5 = arith.sitofp %4 : vector<2x8x10xi32> to vector<2x8x10xf32>
    %cst = arith.constant dense<0.000000e+00> : vector<2x10xf32>
    %6 = vector.multi_reduction <add>, %5, %cst [1] : vector<2x8x10xf32> to vector<2x10xf32>
    %cst_2 = arith.constant 1.250000e-01 : f32
    %7 = vector.broadcast %cst_2 : f32 to vector<2x10xf32>
    %8 = arith.mulf %6, %7 : vector<2x10xf32>
    %c0_3 = arith.constant 0 : index
    %c0_4 = arith.constant 0 : index
    %9 = vector.load %arg2[%c0_3, %c0_4] : memref<10x100xf32, #tpu.memory_space<vmem>>, vector<10x100xf32>
    %c0_5 = arith.constant 0 : index
    %c0_6 = arith.constant 0 : index
    %10 = vector.load %arg3[%c0_5, %c0_6] : memref<100x1xf32, #tpu.memory_space<vmem>>, vector<100x1xf32>
    %cst_7 = arith.constant dense<0.000000e+00> : vector<10x1xf32>
    %11 = tpu.matmul %9, %10, %cst_7 {dimension_numbers = #tpu.dot_dimension_numbers<[1], [0], [0], [1], [0, 0, 1, 1], [], []>} : vector<10x100xf32>, vector<100x1xf32>, vector<10x1xf32> -> vector<10x1xf32>
    %cst_8 = arith.constant dense<0.000000e+00> : vector<2x1xf32>
    %12 = tpu.matmul %8, %11, %cst_8 {dimension_numbers = #tpu.dot_dimension_numbers<[1], [0], [0], [1], [0, 0, 1, 1], [], []>} : vector<2x10xf32>, vector<10x1xf32>, vector<2x1xf32> -> vector<2x1xf32>
    %c0_9 = arith.constant 0 : index
    %c0_10 = arith.constant 0 : index
    %13 = vector.load %arg4[%c0_9, %c0_10] : memref<1x1xf32, #tpu.memory_space<vmem>>, vector<1x1xf32>
    %14 = vector.broadcast %13 : vector<1x1xf32> to vector<2x1xf32>
    %15 = arith.addf %12, %14 : vector<2x1xf32>
    %c0_11 = arith.constant 0 : index
    %c0_12 = arith.constant 0 : index
    %16 = vector.load %arg5[%c0_11, %c0_12] : memref<2x1xf32, #tpu.memory_space<vmem>>, vector<2x1xf32>
    tpu.vector_store %arg5[%c0_11, %c0_12], %15 {strides = array<i32>} : memref<2x1xf32, #tpu.memory_space<vmem>>, vector<2x1xf32>,
    return
  }
  func.func @transform_0(%arg0: i32) -> (i32, i32, i32) {
    %c0_i32 = arith.constant 0 : i32
    %c0_i32_0 = arith.constant 0 : i32
    %c0_i32_1 = arith.constant 0 : i32
    return %arg0, %c0_i32, %c0_i32_0 : i32, i32, i32
  }
  func.func @transform_1(%arg0: i32) -> (i32, i32) {
    %c0_i32 = arith.constant 0 : i32
    %c0_i32_0 = arith.constant 0 : i32
    %c0_i32_1 = arith.constant 0 : i32
    return %c0_i32, %c0_i32_0 : i32, i32
  }
  func.func @transform_2(%arg0: i32) -> (i32, i32) {
    %c0_i32 = arith.constant 0 : i32
    %c0_i32_0 = arith.constant 0 : i32
    %c0_i32_1 = arith.constant 0 : i32
    return %c0_i32, %c0_i32_0 : i32, i32
  }
  func.func @transform_3(%arg0: i32) -> (i32, i32) {
    %c0_i32 = arith.constant 0 : i32
    %c0_i32_0 = arith.constant 0 : i32
    %c0_i32_1 = arith.constant 0 : i32
    return %c0_i32, %c0_i32_0 : i32, i32
  }
  func.func @transform_4(%arg0: i32) -> (i32, i32) {
    %c0_i32 = arith.constant 0 : i32
    %c0_i32_0 = arith.constant 0 : i32
    return %arg0, %c0_i32 : i32, i32
  }
}

</mosaic_0001>

<bundles_post_ra>
// kernel: tpu_custom_call.1
= control target key start
LH: loop header
LB: loop body
LE: loop exit
PB: predicated region body
PF: predicated region fallthrough
CT: control target
= control target key end

     0   :  { %v342_v3 = vmov 0   ;;  %vm67_vm0 = vcmask 818176   ;;  %vm74_vm1 = vcmask 1043456   ;;  %v343_v24 = vmov 0.0|0.0   ;;  %s434_s2 = inlined_call_operand.vmem [shape: f32[100,1], index: 2, kind: input, shape index: {}]   ;;  %s435_s1 = inlined_call_operand.vmem [shape: f32[10,100], index: 1, kind: input, shape index: {}]   ;;  %s436_s0 = inlined_call_operand.vmem [shape: s32[2,8,1], index: 0, kind: input, shape index: {}]   ;;  %s437_s3 = inlined_call_operand.<no memory space> [shape: f32[1,1], index: 3, kind: input, shape index: {}]   ;;  %s438_s4 = inlined_call_operand.vmem [shape: f32[2,1], index: 4, kind: output, shape index: {}]  }
   0x1   :  { %v54_v0 = vld [vmem:[%s434_s2] sm:$0xff]  ;;  %v55_v1 = vld [vmem:[%s434_s2 + $0x8] sm:$0xff]  ;;  %v56_v2 = vld [vmem:[%s434_s2 + $0x10] sm:$0xff]  ;;  %341 = vset.pattern.permute.xlu0 %v342_v3  ;;  %332 = vmatprep.subr.bf16.mxu1 %v343_v24  ;;  %vm344_vm2 = vmmov 0   ;;  %v345_v25 = vmov 0.0   ;;  %v9_v26 = vstv %s437_s3  ;;  %v21_v28 = vlaneseq }
   0x2   :  { %v308_v4 = vpack.c.bf16 %v55_v1, %v54_v0  ;;  %v57_v5 = vld [vmem:[%s434_s2 + $0x18] sm:$0xff]  ;;  %v58_v7 = vld [vmem:[%s434_s2 + $0x20] sm:$0xff]  ;;  %v59_v8 = vld [vmem:[%s434_s2 + $0x28] sm:$0xff]  ;;  %305 = vmatprep.mubr.msk.f32.mxu1 %vm344_vm2, %v345_v25  ;;  %10 = vst [vmem:[#allocation2] sm:$0x1] %v9_v26  ;;  %vm35_vm5 = vcmask 80896  }
   0x3   :  { %v312_v6 = vpack.c.bf16 %v57_v5, %v56_v2  ;;  %v52_v9 = vld [vmem:[%s435_s1] sm:$0xff]  ;;  %v316_v10 = vpack.c.bf16 %v59_v8, %v58_v7  ;;  %v60_v12 = vld [vmem:[%s434_s2 + $0x30] sm:$0xff]  ;;  %v61_v13 = vld [vmem:[%s434_s2 + $0x38] sm:$0xff]  ;;  %v22_v29 = vand.u32 127, %v21_v28  ;;  %vm166_vm6 = vcmask 1041408  }
   0x4   :  { %309 = vmatprep.subr.bf16.mxu0 %v308_v4  ;;  %298 = vmatprep.mubr.msk.f32.mxu0 %vm67_vm0, %v52_v9  ;;  %v19_v11 = vld [vmem:[%s436_s0] sm:$0xff]  ;;  %v20_v14 = vld [vmem:[%s436_s0 + $0x8] sm:$0xff]  ;;  %v320_v15 = vpack.c.bf16 %v61_v13, %v60_v12  ;;  %v64_v19 = vld [vmem:[%s434_s2 + $0x50] sm:$0xff]  ;;  %vm346_vm7 = vmmov 1   ;;  %vm162_vm9 = vcmask 1041409   ;;  %vm240_vm10 = vcmask 1024  }
   0x5   :  { %311 = vmatpush3.bf16.msra.mxu0 %v308_v4  ;;  %24 = vperm.xlu0 %341, %v19_v11   ;;  %v62_v16 = vld [vmem:[%s434_s2 + $0x40] sm:$0xff]  ;;  %v63_v17 = vld [vmem:[%s434_s2 + $0x48] sm:$0xff]  ;;  %v65_v20 = vld [vmem:[%s434_s2 + $0x58] sm:$0xff] }
   0x6   :  { %313 = vmatprep.subr.bf16.mxu0 %v312_v6  ;;  %v324_v18 = vpack.c.bf16 %v63_v17, %v62_v16  ;;  %v328_v21 = vpack.c.bf16 %v65_v20, %v64_v19  ;;  %v66_v22 = vld [vmem:[%s434_s2 + $0x60] sm:$0xf]  ;;  %v53_v23 = vld [vmem:[%s435_s1 + $0x8] sm:$0x3]  ;;  %vm334_vm8 = vmpackc.low %vm166_vm6, %vm346_vm7 }
   0x9   :  { %315 = vmatpush3.bf16.msra.mxu0 %v312_v6  ;;  %27 = vperm.xlu0 %341, %v20_v14   ;;  %v251_v53 = vld [vmem:[#allocation2] ss:$0 sm:$0xff] }
   0xa   :  { %317 = vmatprep.subr.bf16.mxu0 %v316_v10 }
   0xd   :  { %319 = vmatpush3.bf16.msra.mxu0 %v316_v10 }
   0xe   :  { %321 = vmatprep.subr.bf16.mxu0 %v320_v15 }
  0x11   :  { %323 = vmatpush3.bf16.msra.mxu0 %v320_v15 }
  0x12   :  { %325 = vmatprep.subr.bf16.mxu0 %v324_v18 }
  0x15   :  { %327 = vmatpush3.bf16.msra.mxu0 %v324_v18 }
  0x16   :  { %329 = vmatprep.subr.bf16.mxu0 %v328_v21 }
  0x19   :  { %331 = vmatpush3.bf16.msra.mxu0 %v328_v21 }
  0x1a   :  { %296 = vmatprep.subr.msk.mxu0 %vm74_vm1, %v66_v22 }
  0x1d   :  { %297 = vmatpush3.msk.msra.mxu0 %vm74_vm1, %v66_v22 }
  0x1e   :  { %299 = vmatmul.mubr.msk.f32.vlgmr.msra.gmra.mrb[0].mxu0 %vm67_vm0, %v53_v23 }
  0x84   :  { %v25_v27 = vpop.permute.xlu0 %24 }
  0x85   :  { %vm29_vm3 = vcmp.eq.s32.totalorder %v25_v27, %v22_v29 }
  0x86   :  { %v246_v31 = vsel %vm29_vm3, 1.0, %v345_v25 }
  0x87   :  { %v36_v33 = vsel %vm35_vm5, %v246_v31, 0.0 }
  0x88   :  { %v28_v30 = vpop.permute.xlu0 %27  ;;  %v37_v35 = vrot.slane %v36_v33, 4 }
  0x89   :  { %vm30_vm4 = vcmp.eq.s32.totalorder %v28_v30, %v22_v29 }
  0x8a   :  { %v247_v32 = vsel %vm30_vm4, 1.0, %v345_v25  ;;  %v38_v37 = vadd.f32 %v37_v35, %v36_v33 }
  0x8b   :  { %v43_v34 = vsel %vm35_vm5, %v247_v32, 0.0 }
  0x8c   :  { %v44_v36 = vrot.slane %v43_v34, 4  ;;  %v39_v39 = vrot.slane %v38_v37, 2 }
  0x8e   :  { %v45_v38 = vadd.f32 %v44_v36, %v43_v34  ;;  %v40_v41 = vadd.f32 %v39_v39, %v38_v37 }
  0x90   :  { %v46_v40 = vrot.slane %v45_v38, 2  ;;  %v41_v43 = vrot.slane %v40_v41, 1 }
  0x92   :  { %v47_v42 = vadd.f32 %v46_v40, %v45_v38  ;;  %v42_v45 = vadd.f32 %v41_v43, %v40_v41 }
  0x94   :  { %v48_v44 = vrot.slane %v47_v42, 1  ;;  %v50_v50 = vmul.f32 0.125, %v42_v45 }
  0x96   :  { %v49_v46 = vadd.f32 %v48_v44, %v47_v42 }
  0x98   :  { %v51_v51 = vmul.f32 0.125, %v49_v46 }
  0x9a   :  { %v163_v52 = vsel %vm162_vm9, %v51_v51, %v50_v50 }
  0xf1   :  { %v300_v47 = vpop.f32.mrb[0].mxu0 }
  0xf2   :  { %v144_v48 = vpop.f32.mrb[1].mxu0 }
  0xf3   :  { %v333_v49 = vpack.c.bf16 %v300_v47, %v144_v48 }
  0xf5   :  { %335 = vmatpush3.bf16.msk.msra.mxu1 %vm334_vm8, %v333_v49 }
  0xf8   :  { %306 = vmatmul.mubr.msk.f32.vlgmr.msra.gmra.mrb[0].mxu1 %vm35_vm5, %v163_v52 }
 0x1cb   :  { %v236_v54 = vpop.f32.mrb[0].mxu1 }
 0x1cc   :  { %v237_v55 = vadd.f32 %v251_v53, %v236_v54  ;;  %v307_v56 = vpop.f32.mrb[1].mxu1 }
 0x1ce   :  { %241 = vst.msk [vmem:[%s438_s4] sm:$0x3] %vm240_vm10, %v237_v55 }

</bundles_post_ra>
